<compile_context>
chip_gen: v5e
topology: v5e:2x2
jax: 0.10.0
libtpu: 0.0.40
codegen_flags: <defaults>
</compile_context>

<pallas_src>
import jax
import jax.numpy as jnp
from jax.experimental import pallas as pl
from jax.experimental.pallas import tpu as pltpu


# --------------------------------------------------------------------------
# Shared math (elementwise; VPU for mul/add, EUP for sin/cos/exp).
# --------------------------------------------------------------------------
def _cost(x, y):
    x2 = x * x
    y2 = y * y
    xy2 = x2 * y2                      # (x*y)^2 == x^2 * y^2
    s = x + y
    return (-jnp.sin(x2) * jnp.cos(3.0 * y2) * jnp.exp(-xy2)
            - jnp.exp(-(s * s)))


# --------------------------------------------------------------------------
# Scalar forward (matches SimpleDCLModel.forward() exactly).
# --------------------------------------------------------------------------
def _dcl_scalar_kernel(xy_ref, z_ref):
    # xy_ref: (2,) f32 in SMEM -> splat to (1,1) vreg tiles for VPU/EUP math.
    x = jnp.full((1, 1), xy_ref[0], dtype=jnp.float32)
    y = jnp.full((1, 1), xy_ref[1], dtype=jnp.float32)
    z_ref[...] = _cost(x, y)


@jax.jit
def simple_dcl_forward(x, y):
    """Pallas equivalent of SimpleDCLModel.forward(); returns scalar z."""
    xy = jnp.stack([jnp.asarray(x, jnp.float32).reshape(()),
                    jnp.asarray(y, jnp.float32).reshape(())])
    z = pl.pallas_call(
        _dcl_scalar_kernel,
        out_shape=jax.ShapeDtypeStruct((1, 1), jnp.float32),
        in_specs=[pl.BlockSpec(memory_space=pltpu.MemorySpace.SMEM)],
        out_specs=pl.BlockSpec(memory_space=pltpu.MemorySpace.VMEM),
    )(xy)
    return z[0, 0]


# --------------------------------------------------------------------------
# Batched forward: evaluate N (x, y) pairs in one call.
# --------------------------------------------------------------------------
_LANES = 1024        # lane-dense last dim (multiple of 128) -> unmasked vst
_BLOCK_ROWS = 256    # 256 x 1024 x 4 B = 1 MiB per f32 plane per block


def _dcl_batched_kernel(xy_ref, z_ref):
    # xy_ref block: (2, block_rows, _LANES); plane 0 = x, plane 1 = y.
    z_ref[...] = _cost(xy_ref[0], xy_ref[1])


@jax.jit
def simple_dcl_forward_batched(xs, ys):
    """Evaluate cost_func over N (x, y) pairs; returns (N,) f32."""
    n = xs.shape[0]
    xs = xs.astype(jnp.float32)
    ys = ys.astype(jnp.float32)

    # Pad only up to the next lane multiple (< _LANES elements), then stack
    # x/y into one (2, rows, _LANES) operand (one DMA stream per step).
    pad = (-n) % _LANES
    if pad:
        xs = jnp.pad(xs, (0, pad))
        ys = jnp.pad(ys, (0, pad))
    rows = (n + pad) // _LANES
    xy = jnp.stack([xs.reshape(rows, _LANES), ys.reshape(rows, _LANES)])

    # Block rows: big tile (multiple of 8) when possible, else the whole
    # (small) array.  Ragged row tail is handled by Pallas' masked boundary
    # blocks, so no row padding is materialized in HBM.
    block_rows = _BLOCK_ROWS if rows >= _BLOCK_ROWS else rows
    num_blocks = pl.cdiv(rows, block_rows)

    z = pl.pallas_call(
        _dcl_batched_kernel,
        out_shape=jax.ShapeDtypeStruct((rows, _LANES), jnp.float32),
        grid=(num_blocks,),
        in_specs=[pl.BlockSpec((2, block_rows, _LANES), lambda i: (0, i, 0))],
        out_specs=pl.BlockSpec((block_rows, _LANES), lambda i: (i, 0)),
        compiler_params=pltpu.CompilerParams(
            dimension_semantics=("parallel",)),   # 2 TCs on v7x
    )(xy)
    return z.reshape(-1)[:n]


# --------------------------------------------------------------------------
# Pure-JAX reference (matches the PyTorch cost_func expression literally).
# --------------------------------------------------------------------------
def _reference_forward(x, y):
    x = jnp.asarray(x, jnp.float32)
    y = jnp.asarray(y, jnp.float32)
    return (-jnp.sin(x * x) * jnp.cos(3.0 * y * y)
            * jnp.exp(-(x * y) * (x * y))
            - jnp.exp(-(x + y) * (x + y)))


if __name__ == "__main__":
    key = jax.random.PRNGKey(0)
    kx, ky, kb = jax.random.split(key, 3)

    # --- Scalar forward (the actual module semantics) --------------------
    x0 = jax.random.uniform(kx, (), jnp.float32, minval=-2.0, maxval=2.0)
    y0 = jax.random.uniform(ky, (), jnp.float32, minval=-2.0, maxval=2.0)
    z = jax.block_until_ready(simple_dcl_forward(x0, y0))
    z_ref = _reference_forward(x0, y0)
    assert jnp.allclose(z, z_ref, atol=1e-5, rtol=1e-4), (z, z_ref)

    # --- Batched, small (single block; exercises lane-tail padding) ------
    n_small = 2500
    xb = jax.random.uniform(kb, (n_small,), jnp.float32, minval=-2.0, maxval=2.0)
    yb = jax.random.uniform(jax.random.fold_in(kb, 1), (n_small,), jnp.float32,
                            minval=-2.0, maxval=2.0)
    zb = jax.block_until_ready(simple_dcl_forward_batched(xb, yb))
    assert jnp.allclose(zb, _reference_forward(xb, yb), atol=1e-5, rtol=1e-4)

    # --- Batched, multi-block (exercises the MiB tile + ragged row tail) -
    n_big = _LANES * 260 + 321          # rows=261 -> grid=2, partial block
    xb2 = jax.random.uniform(jax.random.fold_in(kb, 2), (n_big,), jnp.float32,
                             minval=-2.0, maxval=2.0)
    yb2 = jax.random.uniform(jax.random.fold_in(kb, 3), (n_big,), jnp.float32,
                             minval=-2.0, maxval=2.0)
    zb2 = jax.block_until_ready(simple_dcl_forward_batched(xb2, yb2))
    assert jnp.allclose(zb2, _reference_forward(xb2, yb2), atol=1e-5, rtol=1e-4)

    # TODO(synk): process()/project2cone2 (quadprog QP solve + gradient
    # surgery) is host-side optimizer logic, not part of forward(); not
    # implemented as a kernel.
    print("KERNEL_OK")
</pallas_src>

<mosaic_0001>
module attributes {stable_mosaic.version = 11 : i64} {
  func.func @_dcl_scalar_kernel(%arg0: memref<2xf32, #tpu.memory_space<smem>>, %arg1: memref<1x1xf32, #tpu.memory_space<vmem>>) attributes {dimension_semantics = [], scalar_prefetch = 0 : i64, scratch_operands = 0 : i64, tpu.core_type = #tpu.core_type<tc>} {
    %c0 = arith.constant 0 : index
    %0 = memref.load %arg0[%c0] : memref<2xf32, #tpu.memory_space<smem>>
    %1 = vector.broadcast %0 : f32 to vector<1x1xf32>
    %c1 = arith.constant 1 : index
    %2 = memref.load %arg0[%c1] : memref<2xf32, #tpu.memory_space<smem>>
    %3 = vector.broadcast %2 : f32 to vector<1x1xf32>
    %4 = arith.mulf %1, %1 : vector<1x1xf32>
    %5 = arith.mulf %3, %3 : vector<1x1xf32>
    %6 = arith.mulf %4, %5 : vector<1x1xf32>
    %7 = arith.addf %1, %3 : vector<1x1xf32>
    %8 = math.sin %4 : vector<1x1xf32>
    %cst = arith.constant 0.000000e+00 : f32
    %9 = vector.broadcast %cst : f32 to vector<1x1xf32>
    %10 = arith.subf %9, %8 : vector<1x1xf32>
    %cst_0 = arith.constant 3.000000e+00 : f32
    %11 = vector.broadcast %cst_0 : f32 to vector<1x1xf32>
    %12 = arith.mulf %11, %5 : vector<1x1xf32>
    %13 = math.cos %12 : vector<1x1xf32>
    %14 = arith.mulf %10, %13 : vector<1x1xf32>
    %cst_1 = arith.constant 0.000000e+00 : f32
    %15 = vector.broadcast %cst_1 : f32 to vector<1x1xf32>
    %16 = arith.subf %15, %6 : vector<1x1xf32>
    %17 = math.exp %16 : vector<1x1xf32>
    %18 = arith.mulf %14, %17 : vector<1x1xf32>
    %19 = arith.mulf %7, %7 : vector<1x1xf32>
    %cst_2 = arith.constant 0.000000e+00 : f32
    %20 = vector.broadcast %cst_2 : f32 to vector<1x1xf32>
    %21 = arith.subf %20, %19 : vector<1x1xf32>
    %22 = math.exp %21 : vector<1x1xf32>
    %23 = arith.subf %18, %22 : vector<1x1xf32>
    %c0_3 = arith.constant 0 : index
    %c0_4 = arith.constant 0 : index
    %24 = vector.load %arg1[%c0_3, %c0_4] : memref<1x1xf32, #tpu.memory_space<vmem>>, vector<1x1xf32>
    tpu.vector_store %arg1[%c0_3, %c0_4], %23 {strides = array<i32>} : memref<1x1xf32, #tpu.memory_space<vmem>>, vector<1x1xf32>,
    return
  }
}

</mosaic_0001>

<bundles_post_ra>
// kernel: simple_dcl_forward.1
= control target key start
LH: loop header
LB: loop body
LE: loop exit
PB: predicated region body
PF: predicated region fallthrough
CT: control target
= control target key end

     0   :  { %6 = vsyncpa [#allocation4], 0  ;;  %s614_s0 = inlined_call_operand.vmem [shape: f32[2], index: 0, kind: input, shape index: {}]   ;;  %s615_s1 = inlined_call_operand.hbm [shape: f32[1,1], index: 1, kind: output, shape index: {}]  }
   0x1   :  { %7 = vsyncpa [#allocation3], 0  ;;  %s13_s8 = sshll.u32 %s614_s0, 4  ;;  %s430_s9 = smov [#allocation2]   ;;  %s14_s8 = int_to_ptr.vmem [resolvable:$true] %s13_s8 }
   0x2   :  { %16 = dma.vmem_to_smem %s14_s8, 16, %s430_s9, [#allocation4]  }
   0x3   :  { %426 = dma.done.wait [#allocation4], 16  }
   0x4   :  { %427 = vsyncadd [#allocation4], 4294967280 }
   0x5   :  { %21 = sfence }
   0x6   :  { %s22_s10 = sld [smem:[#allocation2]]  ;;  %v431_v26 = vmov 683565275   ;;  %v432_v28 = vmov 2475754826   ;;  %s438_s0 = smov [#allocation5]  }
   0x7   :  { %s370_s11 = sld [smem:[#allocation2 + $0x1]]  ;;  %v433_v30 = vmov 2131351028   ;;  %v434_v32 = vmov 2102212464   ;;  %s358_s12 = sshll.u32 %s438_s0, 4  ;;  %s359_s12 = int_to_ptr.vmem [resolvable:$true] %s358_s12 }
   0x8   :  { %v435_v34 = vmov 920167782   ;;  %v436_v41 = vmov 1326507024   ;;  %s360_s15 = sshll.u32 %s615_s1, 4  ;;  %s361_s15 = int_to_ptr.hbm [resolvable:$true] %s360_s15 }
   0xc   :  { %v23_v0 = vstv %s22_s10 }
   0xd   :  { %v25_v1 = vstv %s370_s11  ;;  %v452_v2 = vmul.f32 %v23_v0, %v23_v0 }
   0xe   :  { %v454_v3 = vmul.f32 %v25_v1, %v25_v1  ;;  %v456_v4 = vadd.f32 %v25_v1, %v23_v0 }
   0xf   :  { %v30_v5 = vand.u32 2147483647, %v452_v2  ;;  %v33_v6 = vand.u32 2139095040, %v452_v2 }
  0x10   :  { %v461_v7 = vmul.f32 3.0, %v454_v3 }
  0x11   :  { %v34_v8 = vshrl.u32 %v33_v6, 23  ;;  %v37_v9 = vand.u32 8388607, %v30_v5 }
  0x12   :  { %v187_v10 = vand.u32 2147483647, %v461_v7  ;;  %v190_v11 = vand.u32 2139095040, %v461_v7 }
  0x13   :  { %v371_v12 = vadd.s32 4294967169, %v34_v8  ;;  %v38_v13 = vor.u32 8388608, %v37_v9 }
  0x14   :  { %v191_v14 = vshrl.u32 %v190_v11, 23  ;;  %v194_v18 = vand.u32 8388607, %v187_v10 }
  0x15   :  { %v40_v15 = vadd.s32 1, %v371_v12  ;;  %v467_v16 = vshll.u32 %v38_v13, 8 }
  0x16   :  { %v374_v17 = vadd.s32 4294967169, %v191_v14  ;;  %v195_v24 = vor.u32 8388608, %v194_v18 }
  0x17   :  { %vm41_vm0 = vcmp.gt.s32.totalorder %v40_v15, 0  ;;  %v79_v23 = vand.u32 65535, %v467_v16  ;;  %v80_v60 = vshrl.u32 %v467_v16, 16 }
  0x18   :  { %v42_v19 = vsel %vm41_vm0, %v40_v15, 0  ;;  %v197_v20 = vadd.s32 1, %v374_v17  ;;  %v488_v61 = vshll.u32 %v195_v24, 8 }
  0x19   :  { %v43_v21 = vshrl.u32 %v42_v19, 5  ;;  %v44_v22 = vand.u32 31, %v42_v19 }
  0x1a   :  { %vm198_vm2 = vcmp.gt.s32.totalorder %v197_v20, 0 }
  0x1b   :  { %v45_v25 = vsub.s32 32, %v44_v22  ;;  %v47_v27 = vshll.u32 %v431_v26, %v44_v22  ;;  %v50_v29 = vshll.u32 %v432_v28, %v44_v22  ;;  %v53_v31 = vshll.u32 %v433_v30, %v44_v22 }
  0x1c   :  { %v56_v33 = vshll.u32 %v434_v32, %v44_v22  ;;  %v59_v35 = vshll.u32 %v435_v34, %v44_v22  ;;  %vm62_vm1 = vcmp.lt.s32.totalorder %v43_v21, 1  ;;  %vm63_vm3 = vcmp.lt.s32.totalorder %v43_v21, 2 }
  0x1d   :  { %v46_v36 = vshrl.u32 %v431_v26, %v45_v25  ;;  %v48_v37 = vshrl.u32 %v432_v28, %v45_v25  ;;  %v51_v38 = vshrl.u32 %v433_v30, %v45_v25  ;;  %v54_v39 = vshrl.u32 %v434_v32, %v45_v25 }
  0x1e   :  { %v57_v40 = vshrl.u32 %v435_v34, %v45_v25  ;;  %v60_v42 = vshrl.u32 %v436_v41, %v45_v25  ;;  %vm65_vm4 = vcmp.lt.s32.totalorder %v43_v21, 4  ;;  %v199_v46 = vsel %vm198_vm2, %v197_v20, 0 }
  0x1f   :  { %v49_v43 = vor.u32 %v48_v37, %v47_v27  ;;  %v52_v44 = vor.u32 %v51_v38, %v50_v29  ;;  %v55_v45 = vor.u32 %v54_v39, %v53_v31  ;;  %vm64_vm5 = vcmp.lt.s32.totalorder %v43_v21, 3 }
  0x20   :  { %v58_v47 = vor.u32 %v57_v40, %v56_v33  ;;  %v61_v48 = vor.u32 %v60_v42, %v59_v35  ;;  %v479_v49 = vand.u32 31, %v199_v46  ;;  %v495_v1 = vshrl.u32 %v199_v46, 5 }
  0x21   :  { %v66_v50 = vsel %vm62_vm1, %v46_v36, %v49_v43  ;;  %v67_v51 = vsel %vm65_vm4, %v55_v45, 2102212464  ;;  %v70_v52 = vsel %vm62_vm1, %v49_v43, %v52_v44  ;;  %v74_v53 = vsel %vm62_vm1, %v52_v44, %v55_v45 }
  0x22   :  { %v68_v54 = vsel %vm64_vm5, %v52_v44, %v67_v51  ;;  %v71_v55 = vsel %vm65_vm4, %v58_v47, 920167782  ;;  %v75_v56 = vsel %vm65_vm4, %v61_v48, 1326507024  ;;  %v485_v57 = vsub.s32 32, %v479_v49 }
  0x23   :  { %v72_v58 = vsel %vm64_vm5, %v55_v45, %v71_v55  ;;  %v76_v59 = vsel %vm64_vm5, %v58_v47, %v75_v56  ;;  %v491_v62 = vsel %vm63_vm3, %v66_v50, %v68_v54  ;;  %v204_v12 = vshll.u32 %v431_v26, %v479_v49 }
  0x24   :  { %v73_v63 = vsel %vm63_vm3, %v70_v52, %v72_v58  ;;  %v77_v0 = vsel %vm63_vm3, %v74_v53, %v76_v59  ;;  %v205_v13 = vshrl.u32 %v432_v28, %v485_v57  ;;  %v207_v14 = vshll.u32 %v432_v28, %v479_v49 }
  0x25   :  { %v81_v6 = vand.u32 65535, %v77_v0  ;;  %v82_v8 = vshrl.u32 %v77_v0, 16  ;;  %v103_v9 = vand.u32 65535, %v73_v63  ;;  %v104_v11 = vshrl.u32 %v73_v63, 16 }
  0x26   :  { %v208_v15 = vshrl.u32 %v433_v30, %v485_v57  ;;  %v210_v20 = vshll.u32 %v433_v30, %v479_v49  ;;  %v503_v40 = vor.u32 %v205_v13, %v204_v12  ;;  %v437_v42 = vmov 0  }
  0x27   :  { %v83_v17 = vmul.u32 %v81_v6, %v79_v23  ;;  %v84_v18 = vmul.u32 %v82_v8, %v79_v23  ;;  %v85_v19 = vmul.u32 %v81_v6, %v80_v60  ;;  %v86_v21 = vmul.u32 %v82_v8, %v80_v60 }
  0x28   :  { %v105_v22 = vmul.u32 %v103_v9, %v79_v23  ;;  %v106_v24 = vmul.u32 %v104_v11, %v79_v23  ;;  %v107_v25 = vmul.u32 %v103_v9, %v80_v60  ;;  %v108_v33 = vmul.u32 %v104_v11, %v80_v60 }
  0x29   :  { %v87_v27 = vshll.u32 %v84_v18, 16  ;;  %v88_v29 = vshrl.u32 %v84_v18, 16  ;;  %v89_v31 = vshll.u32 %v85_v19, 16  ;;  %v90_v35 = vshrl.u32 %v85_v19, 16 }
  0x2a   :  { %v109_v36 = vshll.u32 %v106_v24, 16  ;;  %v110_v37 = vshrl.u32 %v106_v24, 16  ;;  %v111_v38 = vshll.u32 %v107_v25, 16  ;;  %v112_v39 = vshrl.u32 %v107_v25, 16 }
  0x2b   :  { %vm91_vm6 = vc.u32 %v83_v17, %v87_v27  ;;  %v93_v28 = vadd.s32 %v87_v27, %v83_v17  ;;  %v211_v23 = vshrl.u32 %v434_v32, %v485_v57  ;;  %v213_v46 = vshll.u32 %v434_v32, %v479_v49 }
  0x2c   :  { %v92_v30 = vsel %vm91_vm6, 1, %v437_v42  ;;  %vm113_vm7 = vc.u32 %v105_v22, %v109_v36  ;;  %v115_v43 = vadd.s32 %v109_v36, %v105_v22  ;;  %v209_v50 = vor.u32 %v208_v15, %v207_v14 }
  0x2d   :  { %v94_v44 = vadd.s32 %v92_v30, %v86_v21  ;;  %vm95_vm8 = vc.u32 %v93_v28, %v89_v31  ;;  %v114_v45 = vsel %vm113_vm7, 1, %v437_v42  ;;  %v212_v53 = vor.u32 %v211_v23, %v210_v20 }
  0x2e   :  { %v96_v47 = vsel %vm95_vm8, 1, %v437_v42  ;;  %v116_v48 = vadd.s32 %v114_v45, %v108_v33  ;;  %vm117_vm9 = vc.u32 %v115_v43, %v111_v38  ;;  %v214_v54 = vshrl.u32 %v435_v34, %v485_v57 }
  0x2f   :  { %v98_v51 = vadd.s32 %v96_v47, %v94_v44  ;;  %v118_v52 = vsel %vm117_vm9, 1, %v437_v42  ;;  %v216_v56 = vshll.u32 %v435_v34, %v479_v49  ;;  %v217_v58 = vshrl.u32 %v436_v41, %v485_v57 }
  0x30   :  { %v120_v55 = vadd.s32 %v118_v52, %v116_v48  ;;  %vm219_vm10 = vcmp.lt.s32.totalorder %v495_v1, 1  ;;  %v520_v59 = vadd.s32 %v115_v43, %v111_v38  ;;  %v215_v60 = vor.u32 %v214_v54, %v213_v46 }
  0x31   :  { %v99_v32 = vadd.s32 %v98_v51, %v88_v29  ;;  %vm221_vm11 = vcmp.lt.s32.totalorder %v495_v1, 3  ;;  %v218_v0 = vor.u32 %v217_v58, %v216_v56  ;;  %vm220_vm12 = vcmp.lt.s32.totalorder %v495_v1, 2 }
  0x32   :  { %v121_v63 = vadd.s32 %v120_v55, %v110_v37  ;;  %vm222_vm13 = vcmp.lt.s32.totalorder %v495_v1, 4  ;;  %v227_v34 = vsel %vm219_vm10, %v503_v40, %v209_v50  ;;  %v236_v9 = vand.u32 65535, %v488_v61 }
  0x33   :  { %v525_v6 = vadd.s32 %v99_v32, %v90_v35  ;;  %v228_v41 = vsel %vm222_vm13, %v215_v60, 920167782  ;;  %v237_v11 = vshrl.u32 %v488_v61, 16  ;;  %v123_v12 = vmul.u32 %v467_v16, %v491_v62 }
  0x34   :  { %v122_v49 = vadd.s32 %v121_v63, %v112_v39  ;;  %v229_v8 = vsel %vm221_vm11, %v212_v53, %v228_v41  ;;  %v231_v14 = vsel %vm219_vm10, %v209_v50, %v212_v53  ;;  %v232_v17 = vsel %vm222_vm13, %v218_v0, 1326507024 }
  0x35   :  { %vm125_vm14 = vc.u32 %v525_v6, %v520_v59  ;;  %v230_v13 = vsel %vm220_vm12, %v227_v34, %v229_v8  ;;  %v233_v20 = vsel %vm221_vm11, %v215_v60, %v232_v17  ;;  %v203_v35 = vshrl.u32 %v431_v26, %v485_v57 }
  0x36   :  { %v126_v15 = vadd.s32 1, %v122_v49  ;;  %v260_v18 = vand.u32 65535, %v230_v13  ;;  %v261_v19 = vshrl.u32 %v230_v13, 16  ;;  %v234_v16 = vsel %vm220_vm12, %v231_v14, %v233_v20 }
  0x37   :  { %v238_v24 = vand.u32 65535, %v234_v16  ;;  %v239_v25 = vshrl.u32 %v234_v16, 16  ;;  %v224_v30 = vsel %vm222_vm13, %v212_v53, 2102212464  ;;  %v223_v26 = vsel %vm219_vm10, %v203_v35, %v503_v40 }
  0x38   :  { %v127_v21 = vsel %vm125_vm14, %v126_v15, %v122_v49  ;;  %v263_v62 = vmul.u32 %v261_v19, %v236_v9  ;;  %v264_v27 = vmul.u32 %v260_v18, %v237_v11  ;;  %v262_v29 = vmul.u32 %v260_v18, %v236_v9 }
  0x39   :  { %v128_v22 = vadd.s32 %v127_v21, %v123_v12  ;;  %v240_v36 = vmul.u32 %v238_v24, %v236_v9  ;;  %v241_v37 = vmul.u32 %v239_v25, %v236_v9  ;;  %v242_v38 = vmul.u32 %v238_v24, %v237_v11 }
  0x3a   :  { %v266_v31 = vshll.u32 %v263_v62, 16  ;;  %v268_v28 = vshll.u32 %v264_v27, 16  ;;  %v243_v43 = vmul.u32 %v239_v25, %v237_v11  ;;  %v265_v45 = vmul.u32 %v261_v19, %v237_v11 }
  0x3b   :  { %v129_v33 = vadd.s32 536870912, %v128_v22  ;;  %v244_v23 = vshll.u32 %v241_v37, 16  ;;  %v246_v44 = vshll.u32 %v242_v38, 16  ;;  %v225_v48 = vsel %vm221_vm11, %v209_v50, %v224_v30 }
  0x3c   :  { %vm270_vm15 = vc.u32 %v262_v29, %v266_v31  ;;  %v272_v46 = vadd.s32 %v266_v31, %v262_v29  ;;  %v245_v54 = vshrl.u32 %v241_v37, 16  ;;  %v267_v58 = vshrl.u32 %v263_v62, 16 }
  0x3d   :  { %v552_v39 = vshrl.u32 %v129_v33, 30  ;;  %vm248_vm0 = vc.u32 %v240_v36, %v244_v23  ;;  %v250_v57 = vadd.s32 %v244_v23, %v240_v36  ;;  %v271_v52 = vsel %vm270_vm15, 1, %v437_v42 }
  0x3e   :  { %v249_v51 = vsel %vm248_vm0, 1, %v437_v42  ;;  %vm274_vm1 = vc.u32 %v272_v46, %v268_v28  ;;  %v273_v32 = vadd.s32 %v271_v52, %v265_v45  ;;  %v247_v63 = vshrl.u32 %v242_v38, 16 }
  0x3f   :  { %v131_v47 = vshll.u32 %v552_v39, 30  ;;  %v251_v55 = vadd.s32 %v249_v51, %v243_v43  ;;  %vm252_vm2 = vc.u32 %v250_v57, %v246_v44  ;;  %v275_v40 = vsel %vm274_vm1, 1, %v437_v42 }
  0x40   :  { %v253_v56 = vsel %vm252_vm2, 1, %v437_v42  ;;  %v269_v50 = vshrl.u32 %v264_v27, 16  ;;  %v277_v34 = vadd.s32 %v275_v40, %v273_v32  ;;  %v276_v8 = vadd.s32 %v272_v46, %v268_v28 }
  0x41   :  { %v132_v53 = vsub.s32 %v128_v22, %v131_v47  ;;  %v255_v0 = vadd.s32 %v253_v56, %v251_v55  ;;  %v226_v11 = vsel %vm220_vm12, %v223_v26, %v225_v48  ;;  %v124_v42 = vadd.s32 %v520_v59, %v525_v6 }
  0x42   :  { %v278_v12 = vadd.s32 %v277_v34, %v267_v58  ;;  %v280_v17 = vmul.u32 %v488_v61, %v226_v11  ;;  %vm32_vm6 = vcmp.lt.s32.totalorder %v452_v2, 0  ;;  %vm574_vm8 = vcmp.le.f32.partialorder %v30_v5, 0.7853982 }
  0x43   :  { %vm133_vm3 = vcmp.lt.s32.totalorder %v132_v53, 0  ;;  %v134_v60 = vsub.s32 0, %v132_v53  ;;  %v256_v49 = vadd.s32 %v255_v0, %v245_v54  ;;  %v154_v32 = vsub.s32 4, %v552_v39 }
  0x44   :  { %v279_v15 = vadd.s32 %v278_v12, %v269_v50  ;;  %vm189_vm10 = vcmp.lt.s32.totalorder %v461_v7, 0  ;;  %vm592_vm11 = vcmp.le.f32.partialorder %v187_v10, 0.7853982  ;;  %v28_v10 = vmul.f32 %v454_v3, %v452_v2 }
  0x45   :  { %v135_v41 = vsel %vm133_vm3, %v134_v60, %v132_v53  ;;  %v257_v13 = vadd.s32 %v256_v49, %v247_v63  ;;  %vm173_vm15 = vweird.f32 %v452_v2  ;;  %vm330_vm3 = vweird.f32 %v461_v7 }
  0x46   :  { %v136_v9 = vclz %v135_v41  ;;  %v283_v18 = vadd.s32 1, %v279_v15  ;;  %v155_v41 = vsel %vm32_vm6, %v154_v32, %v552_v39  ;;  %v342_v3 = vsub.f32 0.0, %v28_v10 }
  0x47   :  { %vm282_vm4 = vc.u32 %v257_v13, %v276_v8  ;;  %v281_v57 = vadd.s32 %v276_v8, %v257_v13  ;;  %v157_v11 = vsel %vm574_vm8, 0, %v155_v41 }
  0x48   :  { %v372_v14 = vadd.s32 4294967294, %v136_v9  ;;  %v284_v62 = vsel %vm282_vm4, %v283_v18, %v279_v15  ;;  %vm351_vm4 = vcmask 0  }
  0x49   :  { %v285_v22 = vadd.s32 %v284_v62, %v280_v17 }
  0x4a   :  { %vm373_vm5 = vcmp.lt.s32.totalorder %v372_v14, 0 }
  0x4b   :  { %v139_v19 = vsel %vm373_vm5, 0, %v372_v14  ;;  %v286_v25 = vadd.s32 536870912, %v285_v22 }
  0x4c   :  { %v140_v20 = vsub.s32 32, %v139_v19  ;;  %v141_v21 = vshll.u32 %v132_v53, %v139_v19  ;;  %v144_v16 = vsub.s32 4294967266, %v139_v19 }
  0x4d   :  { %v287_v31 = vshrl.u32 %v286_v25, 30  ;;  %v346_v25 = vmul.f32 %v456_v4, %v456_v4 }
  0x4e   :  { %v142_v1 = vshrl.u32 %v124_v42, %v140_v20  ;;  %v145_v24 = vadd.s32 127, %v144_v16  ;;  %v174_v42 = vadd.s32 3, %v157_v11 }
  0x4f   :  { %v288_v35 = vshll.u32 %v287_v31, 30  ;;  %v311_v18 = vsub.s32 4, %v287_v31 }
  0x50   :  { %v143_v27 = vor.u32 %v142_v1, %v141_v21  ;;  %v146_v29 = vshll.u32 %v145_v24, 23  ;;  %v175_v62 = vand.u32 3, %v174_v42 }
  0x51   :  { %v289_v37 = vsub.s32 %v285_v22, %v288_v35  ;;  %v312_v24 = vsel %vm189_vm10, %v311_v18, %v287_v31 }
  0x52   :  { %v147_v33 = vor.u32 4788187, %v146_v29  ;;  %v150_v61 = vcvt.s32.f32 %v143_v27  ;;  %vm177_vm12 = vcmp.eq.s32.totalorder %v175_v62, 0  ;;  %vm180_vm13 = vcmp.eq.s32.totalorder %v175_v62, 2 }
  0x53   :  { %vm290_vm7 = vcmp.lt.s32.totalorder %v289_v37, 0  ;;  %v291_v6 = vsub.s32 0, %v289_v37  ;;  %v314_v35 = vsel %vm592_vm11, 0, %v312_v24  ;;  %vm176_vm14 = vcmp.lt.s32.totalorder %v175_v62, 2 }
  0x54   :  { %v148_v36 = vand.u32 2147483647, %v147_v33 }
  0x55   :  { %v292_v30 = vsel %vm290_vm7, %v291_v6, %v289_v37 }
  0x56   :  { %v151_v59 = vmul.f32 %v150_v61, %v148_v36  ;;  %v293_v23 = vclz %v292_v30  ;;  %v331_v30 = vand.u32 3, %v314_v35 }
  0x58   :  { %v152_v28 = vxor.u32 2147483648, %v151_v59  ;;  %v375_v46 = vadd.s32 4294967294, %v293_v23  ;;  %v343_v23 = vmul.f32 1.442695, %v342_v3  ;;  %vm336_vm0 = vcmp.eq.s32.totalorder %v331_v30, 2 }
  0x59   :  { %vm333_vm1 = vcmp.eq.s32.totalorder %v331_v30, 0  ;;  %vm332_vm2 = vcmp.lt.s32.totalorder %v331_v30, 2 }
  0x5a   :  { %v153_v43 = vsel %vm32_vm6, %v152_v28, %v151_v59  ;;  %vm376_vm9 = vcmp.lt.s32.totalorder %v375_v46, 0  ;;  %v347_v59 = vsub.f32 0.0, %v346_v25  ;;  %386 = vpow2.f32 %v343_v23 }
  0x5b   :  { %v156_v44 = vsel %vm574_vm8, %v452_v2, %v153_v43  ;;  %v296_v5 = vsel %vm376_vm9, 0, %v375_v46 }
  0x5c   :  { %v158_v45 = vmul.f32 %v156_v44, %v156_v44  ;;  %v297_v51 = vsub.s32 32, %v296_v5  ;;  %v298_v52 = vshll.u32 %v289_v37, %v296_v5  ;;  %v301_v54 = vsub.s32 4294967266, %v296_v5 }
  0x5e   :  { %v159_v47 = vmul.f32 -0.001358992, %v158_v45  ;;  %v166_v26 = vmul.f32 -0.00019511016, %v158_v45  ;;  %v299_v56 = vshrl.u32 %v281_v57, %v297_v51  ;;  %v302_v58 = vadd.s32 127, %v301_v54 }
  0x60   :  { %v167_v48 = vadd.f32 0.008332121, %v166_v26  ;;  %v160_v53 = vadd.f32 0.041655596, %v159_v47  ;;  %v300_v40 = vor.u32 %v299_v56, %v298_v52  ;;  %v303_v0 = vshll.u32 %v302_v58, 23  ;;  %v387_v2 = vpop.eup %386 }
  0x61   :  { %v348_v47 = vmul.f32 1.442695, %v347_v59 }
  0x62   :  { %v168_v55 = vmul.f32 %v167_v48, %v158_v45  ;;  %v161_v60 = vmul.f32 %v160_v53, %v158_v45  ;;  %v304_v50 = vor.u32 4788187, %v303_v0  ;;  %v307_v34 = vcvt.s32.f32 %v300_v40 }
  0x63   :  { %388 = vpow2.f32 %v348_v47 }
  0x64   :  { %v169_v63 = vadd.f32 -0.16666654, %v168_v55  ;;  %v162_v49 = vadd.f32 -0.4999988, %v161_v60  ;;  %v305_v9 = vand.u32 2147483647, %v304_v50 }
  0x66   :  { %v170_v8 = vmul.f32 %v169_v63, %v158_v45  ;;  %v308_v12 = vmul.f32 %v307_v34, %v305_v9  ;;  %v163_v13 = vmul.f32 %v162_v49, %v158_v45 }
  0x68   :  { %v171_v14 = vadd.f32 1.0, %v170_v8  ;;  %v309_v17 = vxor.u32 2147483648, %v308_v12  ;;  %v164_v20 = vadd.f32 1.0, %v163_v13 }
  0x69   :  { %v389_v58 = vpop.eup %388 }
  0x6a   :  { %v310_v39 = vsel %vm189_vm10, %v309_v17, %v308_v12  ;;  %v172_v21 = vmul.f32 %v171_v14, %v156_v44  ;;  %v181_v29 = vxor.u32 2147483648, %v164_v20 }
  0x6b   :  { %v313_v19 = vsel %vm592_vm11, %v461_v7, %v310_v39 }
  0x6c   :  { %v315_v16 = vmul.f32 %v313_v19, %v313_v19  ;;  %v178_v27 = vxor.u32 2147483648, %v172_v21  ;;  %v182_v38 = vsel %vm180_vm13, %v181_v29, %v172_v21 }
  0x6e   :  { %v316_v22 = vmul.f32 -0.001358992, %v315_v16  ;;  %v323_v1 = vmul.f32 -0.00019511016, %v315_v16  ;;  %v179_v6 = vsel %vm177_vm12, %v164_v20, %v178_v27 }
  0x6f   :  { %v183_v44 = vsel %vm176_vm14, %v179_v6, %v182_v38 }
  0x70   :  { %v317_v33 = vadd.f32 0.041655596, %v316_v22  ;;  %v324_v61 = vadd.f32 0.008332121, %v323_v1  ;;  %v184_v26 = vsel %vm173_vm15, nan, %v183_v44 }
  0x71   :  { %v185_v52 = vsub.f32 0.0, %v184_v26 }
  0x72   :  { %v318_v36 = vmul.f32 %v317_v33, %v315_v16  ;;  %v325_v37 = vmul.f32 %v324_v61, %v315_v16 }
  0x74   :  { %v319_v31 = vadd.f32 -0.4999988, %v318_v36  ;;  %v326_v28 = vadd.f32 -0.16666654, %v325_v37 }
  0x76   :  { %v320_v4 = vmul.f32 %v319_v31, %v315_v16  ;;  %v327_v43 = vmul.f32 %v326_v28, %v315_v16 }
  0x78   :  { %v321_v45 = vadd.f32 1.0, %v320_v4  ;;  %v328_v46 = vadd.f32 1.0, %v327_v43 }
  0x7a   :  { %v329_v57 = vmul.f32 %v328_v46, %v313_v19  ;;  %v337_v5 = vxor.u32 2147483648, %v321_v45 }
  0x7c   :  { %v334_v48 = vxor.u32 2147483648, %v329_v57  ;;  %v338_v51 = vsel %vm336_vm0, %v337_v5, %v329_v57 }
  0x7e   :  { %v335_v53 = vsel %vm333_vm1, %v321_v45, %v334_v48 }
  0x7f   :  { %v339_v54 = vsel %vm332_vm2, %v335_v53, %v338_v51 }
  0x80   :  { %v340_v55 = vsel %vm330_vm3, nan, %v339_v54 }
  0x81   :  { %v341_v56 = vmul.f32 %v340_v55, %v185_v52 }
  0x83   :  { %v345_v32 = vmul.f32 %v387_v2, %v341_v56 }
  0x85   :  { %v350_v40 = vsub.f32 %v345_v32, %v389_v58 }
  0x87   :  { %352 = vst.msk [vmem:[#allocation5] sm:$0x1] %vm351_vm4, %v350_v40 }
  0x88   :  { %363 = dma.vmem_to_hbm [thread:$0]  %s359_s12, 16, %s361_s15, [#allocation3]  }
  0x89   :  { %428 = dma.done.wait [#allocation3], 16  }
  0x8a   :  { %429 = vsyncadd [#allocation3], 4294967280 }
  0x8b   :  { %368 = vsyncpa [#allocation3], 1 }
  0x8c   :  { %369 = vsyncpa [#allocation4], 1 }

</bundles_post_ra>
